<compile_context>
chip_gen: v6e
topology: v6e:2x2x1
jax: 0.10.0
libtpu: 0.0.40
codegen_flags: <defaults>
</compile_context>

<pallas_src>
import functools

import jax
import jax.numpy as jnp
from jax.experimental import pallas as pl
from jax.experimental.pallas import tpu as pltpu


def _make_adain_kernel(eps, row_tile, hw_true, hw_pad):
    need_mask = hw_pad != hw_true
    inv_n = 1.0 / float(hw_true)

    def kernel(x_ref, w_ref, b_ref, o_ref):
        # x_ref/o_ref: (row_tile, hw_pad); w_ref/b_ref: (BC_pad, 1) resident.
        i = pl.program_id(0)
        r0 = pl.multiple_of(i * row_tile, 8)
        w = w_ref[pl.ds(r0, row_tile), :]
        b = b_ref[pl.ds(r0, row_tile), :]

        x = x_ref[...].astype(jnp.float32)
        # Padded lanes are zero, so the raw sum is the true sum; divide by the
        # true element count.
        mean = jnp.sum(x, axis=1, keepdims=True) * inv_n
        centered = x - mean
        if need_mask:
            lane = jax.lax.broadcasted_iota(jnp.int32, x.shape, 1)
            c_valid = jnp.where(lane < hw_true, centered, 0.0)
        else:
            c_valid = centered
        var = jnp.sum(c_valid * c_valid, axis=1, keepdims=True) * inv_n  # biased
        scale = jax.lax.rsqrt(var + eps) * w
        o_ref[...] = (centered * scale + b).astype(o_ref.dtype)

    return kernel


def adaptive_instance_norm_2d(x, weight, bias, eps=1e-5):
    """x: (B, C, H, W); weight, bias: (B*C,)  -> (B, C, H, W)."""
    B, C, H, W = x.shape
    BC, HW = B * C, H * W
    assert weight.shape == (BC,) and bias.shape == (BC,)

    itemsize = jnp.dtype(x.dtype).itemsize
    pack = max(8, 32 // itemsize)          # sublane packing: f32->8, bf16->16
    HW_pad = pl.cdiv(HW, 128) * 128        # lane-dense last dim

    # Pick row_tile so one data block is ~2 MiB (mem-bound sweet spot), as a
    # multiple of `pack`, and keep >= ~4 grid steps when B*C is large enough
    # (v7x shards the parallel axis across 2 TensorCores).
    target_block_bytes = 2 * 1024 * 1024
    row_bytes = HW_pad * itemsize
    row_tile = max(pack, (target_block_bytes // (row_bytes * pack)) * pack)
    if BC >= 4 * pack:
        row_tile = min(row_tile, max(pack, ((BC // 4) // pack) * pack))
    row_tile = min(row_tile, pl.cdiv(BC, pack) * pack)
    n_blocks = pl.cdiv(BC, row_tile)
    BC_pad = n_blocks * row_tile

    x2d = x.reshape(BC, HW)
    if BC_pad != BC or HW_pad != HW:
        x2d = jnp.pad(x2d, ((0, BC_pad - BC), (0, HW_pad - HW)))
    w2d = weight.astype(jnp.float32).reshape(BC, 1)
    b2d = bias.astype(jnp.float32).reshape(BC, 1)
    if BC_pad != BC:
        w2d = jnp.pad(w2d, ((0, BC_pad - BC), (0, 0)))
        b2d = jnp.pad(b2d, ((0, BC_pad - BC), (0, 0)))

    # VMEM budget: double-buffered input + output blocks + resident w/b + slack.
    # Capped at 64 MiB to stay within v7x's per-core VMEM. Extremely large H*W
    # (single-pack block > ~8 MiB) would need an additional spatial split.
    block_bytes = row_tile * HW_pad * itemsize
    needed = 4 * block_bytes + 4 * (BC_pad * 4) + (4 << 20)
    vmem_limit = int(min(max(needed, 32 << 20), 64 << 20))

    out2d = pl.pallas_call(
        _make_adain_kernel(eps, row_tile, HW, HW_pad),
        out_shape=jax.ShapeDtypeStruct((BC_pad, HW_pad), x.dtype),
        grid=(n_blocks,),
        in_specs=[
            pl.BlockSpec((row_tile, HW_pad), lambda i: (i, 0)),
            pl.BlockSpec((BC_pad, 1), lambda i: (0, 0)),   # resident weight
            pl.BlockSpec((BC_pad, 1), lambda i: (0, 0)),   # resident bias
        ],
        out_specs=pl.BlockSpec((row_tile, HW_pad), lambda i: (i, 0)),
        compiler_params=pltpu.CompilerParams(
            dimension_semantics=("parallel",),
            vmem_limit_bytes=vmem_limit,
        ),
    )(x2d, w2d, b2d)

    if BC_pad != BC or HW_pad != HW:
        out2d = out2d[:BC, :HW]
    return out2d.reshape(B, C, H, W)


def _reference(x, weight, bias, eps=1e-5):
    B, C, H, W = x.shape
    x2d = x.reshape(B * C, H * W).astype(jnp.float32)
    mean = jnp.mean(x2d, axis=1, keepdims=True)
    var = jnp.mean((x2d - mean) ** 2, axis=1, keepdims=True)
    y = (x2d - mean) / jnp.sqrt(var + eps)
    y = y * weight[:, None] + bias[:, None]
    return y.reshape(B, C, H, W).astype(x.dtype)


if __name__ == "__main__":
    # TODO(synk): the full MUNIT generator (convs, upsampling, MLP, checkpoint
    # loading) is not re-implemented here; only the AdaIN norm is kernelized.
    B, C, H, W = 2, 4, 16, 16

    key = jax.random.PRNGKey(0)
    kx, kw, kb = jax.random.split(key, 3)
    x = jax.random.normal(kx, (B, C, H, W), dtype=jnp.float32)
    # weight/bias are assigned externally per (b, c) channel by assign_adain_params.
    weight = jax.random.normal(kw, (B * C,), dtype=jnp.float32) + 1.0
    bias = jax.random.normal(kb, (B * C,), dtype=jnp.float32) * 0.1

    fn = jax.jit(functools.partial(adaptive_instance_norm_2d, eps=1e-5))
    out = jax.block_until_ready(fn(x, weight, bias))

    ref = _reference(x, weight, bias, eps=1e-5)
    assert jnp.allclose(out, ref, atol=1e-4, rtol=1e-4), "mismatch vs reference"

    print("KERNEL_OK")
</pallas_src>

<mosaic_0001>
module attributes {stable_mosaic.version = 11 : i64} {
  func.func @kernel(%arg0: i32, %arg1: memref<8x256xf32, #tpu.memory_space<vmem>>, %arg2: memref<8x1xf32, #tpu.memory_space<vmem>>, %arg3: memref<8x1xf32, #tpu.memory_space<vmem>>, %arg4: memref<8x256xf32, #tpu.memory_space<vmem>>) attributes {dimension_semantics = [#tpu.dimension_semantics<parallel>], iteration_bounds = array<i64: 1>, scalar_prefetch = 0 : i64, scratch_operands = 0 : i64, tpu.core_type = #tpu.core_type<tc>, window_params = [{transform_indices = @transform_0, window_bounds = array<i64: 8, 256>}, {pipeline_mode = #tpu.pipeline_mode<synchronous>, transform_indices = @transform_1, window_bounds = array<i64: 8, 1>}, {pipeline_mode = #tpu.pipeline_mode<synchronous>, transform_indices = @transform_2, window_bounds = array<i64: 8, 1>}, {transform_indices = @transform_3, window_bounds = array<i64: 8, 256>}]} {
    %c8_i32 = arith.constant 8 : i32
    %0 = arith.muli %arg0, %c8_i32 : i32
    %1 = tpu.assume_multiple %0, 8 : i32
    %2 = arith.index_cast %1 : i32 to index
    %c0 = arith.constant 0 : index
    %3 = vector.load %arg2[%2, %c0] : memref<8x1xf32, #tpu.memory_space<vmem>>, vector<8x1xf32>
    %4 = arith.index_cast %1 : i32 to index
    %c0_0 = arith.constant 0 : index
    %5 = vector.load %arg3[%4, %c0_0] : memref<8x1xf32, #tpu.memory_space<vmem>>, vector<8x1xf32>
    %c0_1 = arith.constant 0 : index
    %c0_2 = arith.constant 0 : index
    %6 = vector.load %arg1[%c0_1, %c0_2] : memref<8x256xf32, #tpu.memory_space<vmem>>, vector<8x256xf32>
    %cst = arith.constant dense<0.000000e+00> : vector<8xf32>
    %7 = vector.multi_reduction <add>, %6, %cst [1] : vector<8x256xf32> to vector<8xf32>
    %8 = vector.shape_cast %7 : vector<8xf32> to vector<8x1xf32>
    %cst_3 = arith.constant 3.906250e-03 : f32
    %9 = vector.broadcast %cst_3 : f32 to vector<8x1xf32>
    %10 = arith.mulf %8, %9 : vector<8x1xf32>
    %11 = vector.broadcast %10 : vector<8x1xf32> to vector<8x256xf32>
    %12 = arith.subf %6, %11 : vector<8x256xf32>
    %13 = arith.mulf %12, %12 : vector<8x256xf32>
    %cst_4 = arith.constant dense<0.000000e+00> : vector<8xf32>
    %14 = vector.multi_reduction <add>, %13, %cst_4 [1] : vector<8x256xf32> to vector<8xf32>
    %15 = vector.shape_cast %14 : vector<8xf32> to vector<8x1xf32>
    %cst_5 = arith.constant 3.906250e-03 : f32
    %16 = vector.broadcast %cst_5 : f32 to vector<8x1xf32>
    %17 = arith.mulf %15, %16 : vector<8x1xf32>
    %cst_6 = arith.constant 9.99999974E-6 : f32
    %18 = vector.broadcast %cst_6 : f32 to vector<8x1xf32>
    %19 = arith.addf %17, %18 : vector<8x1xf32>
    %20 = math.rsqrt %19 : vector<8x1xf32>
    %21 = arith.mulf %20, %3 : vector<8x1xf32>
    %22 = vector.broadcast %21 : vector<8x1xf32> to vector<8x256xf32>
    %23 = arith.mulf %12, %22 : vector<8x256xf32>
    %24 = vector.broadcast %5 : vector<8x1xf32> to vector<8x256xf32>
    %25 = arith.addf %23, %24 : vector<8x256xf32>
    %c0_7 = arith.constant 0 : index
    %c0_8 = arith.constant 0 : index
    %26 = vector.load %arg4[%c0_7, %c0_8] : memref<8x256xf32, #tpu.memory_space<vmem>>, vector<8x256xf32>
    tpu.vector_store %arg4[%c0_7, %c0_8], %25 {strides = array<i32>} : memref<8x256xf32, #tpu.memory_space<vmem>>, vector<8x256xf32>,
    return
  }
  func.func @transform_0(%arg0: i32) -> (i32, i32) {
    %c0_i32 = arith.constant 0 : i32
    %c0_i32_0 = arith.constant 0 : i32
    return %arg0, %c0_i32 : i32, i32
  }
  func.func @transform_1(%arg0: i32) -> (i32, i32) {
    %c0_i32 = arith.constant 0 : i32
    %c0_i32_0 = arith.constant 0 : i32
    %c0_i32_1 = arith.constant 0 : i32
    return %c0_i32, %c0_i32_0 : i32, i32
  }
  func.func @transform_2(%arg0: i32) -> (i32, i32) {
    %c0_i32 = arith.constant 0 : i32
    %c0_i32_0 = arith.constant 0 : i32
    %c0_i32_1 = arith.constant 0 : i32
    return %c0_i32, %c0_i32_0 : i32, i32
  }
  func.func @transform_3(%arg0: i32) -> (i32, i32) {
    %c0_i32 = arith.constant 0 : i32
    %c0_i32_0 = arith.constant 0 : i32
    return %arg0, %c0_i32 : i32, i32
  }
}

</mosaic_0001>

<bundles_post_ra>
// kernel: adaptive_instance_norm_2d.1
= control target key start
LH: loop header
LB: loop body
LE: loop exit
PB: predicated region body
PF: predicated region fallthrough
CT: control target
= control target key end

     0   :  { %v61_v10 = vmov 0   ;;  %s100_s0 = inlined_call_operand.vmem [shape: f32[8,256], index: 0, kind: input, shape index: {}]   ;;  %s101_s1 = inlined_call_operand.vmem [shape: f32[8,1], index: 1, kind: input, shape index: {}]   ;;  %s102_s2 = inlined_call_operand.vmem [shape: f32[8,1], index: 2, kind: input, shape index: {}]   ;;  %s103_s3 = inlined_call_operand.vmem [shape: f32[8,256], index: 3, kind: output, shape index: {}]  }
   0x1   :  { %v19_v0 = vld [vmem:[%s100_s0] sm:$0xff]  ;;  %v20_v1 = vld [vmem:[%s100_s0 + $0x8] sm:$0xff]  ;;  %57 = vset.pattern.permute.xlu1 %v61_v10  ;;  %58 = vset.pattern.permute.xlu0 %v61_v10 }
   0x2   :  { %v21_v2 = vadd.f32 %v20_v1, %v19_v0  ;;  %v16_v14 = vld [vmem:[%s101_s1] sm:$0xff] }
   0x3   :  { %v18_v17 = vld [vmem:[%s102_s2] sm:$0xff] }
   0x4   :  { %22 = vadd.xlane.f32.xlu0 %v21_v2 }
  0x8d   :  { %v23_v3 = vpop.xlane.xlu0 %22 }
  0x8e   :  { %v24_v4 = vmul.f32 0.00390625, %v23_v3 }
  0x90   :  { %v25_v5 = vsub.f32 %v19_v0, %v24_v4  ;;  %v26_v6 = vsub.f32 %v20_v1, %v24_v4 }
  0x92   :  { %v27_v7 = vmul.f32 %v25_v5, %v25_v5  ;;  %v28_v8 = vmul.f32 %v26_v6, %v26_v6 }
  0x94   :  { %v29_v9 = vadd.f32 %v28_v8, %v27_v7 }
  0x96   :  { %30 = vadd.xlane.f32.xlu0 %v29_v9 }
 0x11f   :  { %v31_v11 = vpop.xlane.xlu0 %30 }
 0x120   :  { %v32_v12 = vmul.f32 0.00390625, %v31_v11 }
 0x122   :  { %v33_v13 = vadd.f32 1e-05, %v32_v12 }
 0x124   :  { %59 = vrsqrt.f32 %v33_v13 }
 0x131   :  { %v60_v15 = vpop.eup %59 }
 0x132   :  { %v35_v16 = vmul.f32 %v60_v15, %v16_v14 }
 0x134   :  { %38 = vperm.xlu1 %57, %v35_v16  }
 0x138   :  { %45 = vperm.xlu1 %57, %v18_v17  }
 0x1af   :  { %v39_v18 = vpop.permute.xlu1 %38 }
 0x1b0   :  { %v41_v19 = vmul.f32 %v39_v18, %v25_v5  ;;  %v42_v20 = vmul.f32 %v39_v18, %v26_v6 }
 0x1b3   :  { %v46_v21 = vpop.permute.xlu1 %45 }
 0x1b4   :  { %v48_v22 = vadd.f32 %v46_v21, %v41_v19  ;;  %v49_v23 = vadd.f32 %v46_v21, %v42_v20 }
 0x1b6   :  { %50 = vst [vmem:[%s103_s3] sm:$0xff] %v48_v22  ;;  %51 = vst [vmem:[%s103_s3 + $0x8] sm:$0xff] %v49_v23 }

</bundles_post_ra>
